<compile_context>
chip_gen: v5e
topology: v5e:2x2
jax: 0.10.0
libtpu: 0.0.40
codegen_flags: <defaults>
</compile_context>

<pallas_src>
import functools

import jax
import jax.numpy as jnp
from jax.experimental import pallas as pl
from jax.experimental.pallas import tpu as pltpu

LANE = 128  # TPU lane width


def _round_up(x: int, m: int) -> int:
    return ((x + m - 1) // m) * m


def cate_predictor_kernel(x_ref, w_ref, b_ref, o_ref):
    # x_ref: [TM, C] bf16, w_ref: [C, Np] bf16, b_ref: [1, Np] f32, o_ref: [TM, Np] f32
    logits = jnp.dot(x_ref[...], w_ref[...], preferred_element_type=jnp.float32)
    logits = logits + b_ref[...]                    # f32 bias broadcast over batch rows
    o_ref[...] = jax.nn.sigmoid(logits).astype(o_ref.dtype)


def prepare_params(weight, bias, *, n_pad_to=LANE):
    """One-time parameter prep (outside the hot path).

    weight: [N, C] (PyTorch layout) -> returns [C, Np] bf16, bias -> [1, Np] f32,
    with the class dim padded up to a multiple of `n_pad_to` (zeros).
    """
    n, c = weight.shape
    n_pad = _round_up(n, n_pad_to)
    w_cn = jnp.zeros((c, n_pad), dtype=jnp.bfloat16)
    w_cn = w_cn.at[:, :n].set(weight.T.astype(jnp.bfloat16))
    b_1n = jnp.zeros((1, n_pad), dtype=jnp.float32)
    b_1n = b_1n.at[:, :n].set(bias.astype(jnp.float32))
    return w_cn, b_1n


def cate_predictor(x, w_cn, b_1n, num_classes, *, tm=512):
    """x: [B, C] f32; w_cn: [C, Np] bf16 (pre-transposed/padded); b_1n: [1, Np] f32."""
    B, C = x.shape
    Np = w_cn.shape[1]

    # Batch tile: multiple of 8 sublanes, capped by the (padded) batch size.
    tm = max(8, min(tm, _round_up(B, 8)))
    B_pad = _round_up(B, tm)

    x_bf16 = x.astype(jnp.bfloat16)
    if B_pad != B:
        x_bf16 = jnp.pad(x_bf16, ((0, B_pad - B), (0, 0)))

    grid = (B_pad // tm,)

    out_padded = pl.pallas_call(
        cate_predictor_kernel,
        out_shape=jax.ShapeDtypeStruct((B_pad, Np), jnp.float32),
        grid_spec=pltpu.PrefetchScalarGridSpec(
            num_scalar_prefetch=0,
            grid=grid,
            in_specs=[
                pl.BlockSpec((tm, C), lambda i: (i, 0)),   # streamed x tile
                pl.BlockSpec((C, Np), lambda i: (0, 0)),   # resident weight
                pl.BlockSpec((1, Np), lambda i: (0, 0)),   # resident bias
            ],
            out_specs=pl.BlockSpec((tm, Np), lambda i: (i, 0)),
        ),
        compiler_params=pltpu.CompilerParams(
            dimension_semantics=("parallel",),             # shards batch tiles on v7x's 2 TCs
        ),
        cost_estimate=pl.CostEstimate(
            flops=2 * B_pad * C * Np,
            transcendentals=B_pad * Np,
            bytes_accessed=(B_pad * C * 2) + (C * Np * 2) + (Np * 4) + (B_pad * Np * 4),
        ),
    )(x_bf16, w_cn, b_1n)

    return out_padded[:B, :num_classes]


def init_params(key, inchannels, num_classes):
    """Deterministic init mirroring CatePredictor.init_weights():
    xavier_uniform_ for weight, bias filled with 0.01. PyTorch layout [N, C]."""
    limit = jnp.sqrt(6.0 / (inchannels + num_classes))
    weight = jax.random.uniform(
        key, (num_classes, inchannels), dtype=jnp.float32,
        minval=-limit, maxval=limit)
    bias = jnp.full((num_classes,), 0.01, dtype=jnp.float32)
    return weight, bias


if __name__ == "__main__":
    # Small shapes consistent with the module's forward: x is [B, inchannels].
    B, inchannels, num_classes = 8, 128, 50

    key = jax.random.PRNGKey(0)
    kx, kw = jax.random.split(key)

    x = jax.random.normal(kx, (B, inchannels), dtype=jnp.float32)
    weight, bias = init_params(kw, inchannels, num_classes)

    # One-time parameter prep (transpose + lane padding + bf16 cast).
    w_cn, b_1n = prepare_params(weight, bias)

    out = cate_predictor(x, w_cn, b_1n, num_classes)
    out = jax.block_until_ready(out)

    # Reference check in plain JAX (same math as torch.sigmoid(Linear(x))).
    # bf16 matmul inputs -> loosen tolerance vs the f32 reference.
    ref = jax.nn.sigmoid(x @ weight.T + bias)
    assert out.shape == (B, num_classes)
    assert jnp.allclose(out, ref, atol=2e-2, rtol=2e-2), float(
        jnp.max(jnp.abs(out - ref)))

    print("KERNEL_OK")
</pallas_src>

<mosaic_0001>
module attributes {stable_mosaic.version = 11 : i64} {
  func.func @cate_predictor_kernel(%arg0: i32, %arg1: memref<8x128xbf16, #tpu.memory_space<vmem>>, %arg2: memref<128x128xbf16, #tpu.memory_space<vmem>>, %arg3: memref<1x128xf32, #tpu.memory_space<vmem>>, %arg4: memref<8x128xf32, #tpu.memory_space<vmem>>) attributes {dimension_semantics = [#tpu.dimension_semantics<parallel>], iteration_bounds = array<i64: 1>, scalar_prefetch = 0 : i64, scratch_operands = 0 : i64, tpu.core_type = #tpu.core_type<tc>, window_params = [{transform_indices = @transform_0, window_bounds = array<i64: 8, 128>}, {pipeline_mode = #tpu.pipeline_mode<synchronous>, transform_indices = @transform_1, window_bounds = array<i64: 128, 128>}, {pipeline_mode = #tpu.pipeline_mode<synchronous>, transform_indices = @transform_2, window_bounds = array<i64: 1, 128>}, {transform_indices = @transform_3, window_bounds = array<i64: 8, 128>}]} {
    %c0 = arith.constant 0 : index
    %c0_0 = arith.constant 0 : index
    %0 = vector.load %arg1[%c0, %c0_0] : memref<8x128xbf16, #tpu.memory_space<vmem>>, vector<8x128xbf16>
    %c0_1 = arith.constant 0 : index
    %c0_2 = arith.constant 0 : index
    %1 = vector.load %arg2[%c0_1, %c0_2] : memref<128x128xbf16, #tpu.memory_space<vmem>>, vector<128x128xbf16>
    %cst = arith.constant dense<0.000000e+00> : vector<8x128xf32>
    %2 = tpu.matmul %0, %1, %cst {dimension_numbers = #tpu.dot_dimension_numbers<[1], [0], [0], [1], [0, 0, 1, 1], [], []>} : vector<8x128xbf16>, vector<128x128xbf16>, vector<8x128xf32> -> vector<8x128xf32>
    %c0_3 = arith.constant 0 : index
    %c0_4 = arith.constant 0 : index
    %3 = vector.load %arg3[%c0_3, %c0_4] : memref<1x128xf32, #tpu.memory_space<vmem>>, vector<1x128xf32>
    %4 = vector.broadcast %3 : vector<1x128xf32> to vector<8x128xf32>
    %5 = arith.addf %2, %4 : vector<8x128xf32>
    %6 = arith.negf %5 : vector<8x128xf32>
    %7 = math.exp %6 : vector<8x128xf32>
    %cst_5 = arith.constant 1.000000e+00 : f32
    %8 = vector.broadcast %cst_5 : f32 to vector<8x128xf32>
    %9 = arith.addf %8, %7 : vector<8x128xf32>
    %10 = arith.divf %8, %9 : vector<8x128xf32>
    %c0_6 = arith.constant 0 : index
    %c0_7 = arith.constant 0 : index
    %11 = vector.load %arg4[%c0_6, %c0_7] : memref<8x128xf32, #tpu.memory_space<vmem>>, vector<8x128xf32>
    tpu.vector_store %arg4[%c0_6, %c0_7], %10 {strides = array<i32>} : memref<8x128xf32, #tpu.memory_space<vmem>>, vector<8x128xf32>,
    return
  }
  func.func @transform_0(%arg0: i32) -> (i32, i32) {
    %c0_i32 = arith.constant 0 : i32
    %c0_i32_0 = arith.constant 0 : i32
    return %arg0, %c0_i32 : i32, i32
  }
  func.func @transform_1(%arg0: i32) -> (i32, i32) {
    %c0_i32 = arith.constant 0 : i32
    %c0_i32_0 = arith.constant 0 : i32
    %c0_i32_1 = arith.constant 0 : i32
    return %c0_i32, %c0_i32_0 : i32, i32
  }
  func.func @transform_2(%arg0: i32) -> (i32, i32) {
    %c0_i32 = arith.constant 0 : i32
    %c0_i32_0 = arith.constant 0 : i32
    %c0_i32_1 = arith.constant 0 : i32
    return %c0_i32, %c0_i32_0 : i32, i32
  }
  func.func @transform_3(%arg0: i32) -> (i32, i32) {
    %c0_i32 = arith.constant 0 : i32
    %c0_i32_0 = arith.constant 0 : i32
    return %arg0, %c0_i32 : i32, i32
  }
}

</mosaic_0001>

<bundles_post_ra>
// kernel: tpu_custom_call.1
= control target key start
LH: loop header
LB: loop body
LE: loop exit
PB: predicated region body
PF: predicated region fallthrough
CT: control target
= control target key end

     0   :  { %8 = vsyncpa [#allocation3], 0  ;;  %s331_s0 = inlined_call_operand.hbm [shape: bf16[8,128], index: 0, kind: input, shape index: {}]   ;;  %s332_s1 = inlined_call_operand.hbm [shape: bf16[128,128], index: 1, kind: input, shape index: {}]   ;;  %s333_s2 = inlined_call_operand.vmem [shape: f32[1,128], index: 2, kind: input, shape index: {}]   ;;  %s334_s3 = inlined_call_operand.hbm [shape: f32[8,128], index: 3, kind: output, shape index: {}]  }
   0x1   :  { %9 = vsyncpa [#allocation6], 0 }
   0x2   :  { %10 = vsyncpa [#allocation4], 0  ;;  %s16_s14 = sshll.u32 %s331_s0, 4  ;;  %s294_s15 = smov [#allocation2]   ;;  %s17_s14 = int_to_ptr.hbm [resolvable:$true] %s16_s14 }
   0x3   :  { %s18_s16 = sshll.u32 %s294_s15, 4  ;;  %s26_s19 = sshll.u32 %s332_s1, 4  ;;  %s19_s16 = int_to_ptr.vmem [resolvable:$true] %s18_s16  ;;  %s27_s19 = int_to_ptr.hbm [resolvable:$true] %s26_s19 }
   0x4   :  { %21 = dma.hbm_to_vmem [thread:$0]  %s17_s14, 64, %s19_s16, [#allocation3]  }
   0x5   :  { %s295_s20 = smov [#allocation5]   ;;  %s296_s22 = smov 64  }
   0x6   :  { %s28_s21 = sshll.u32 %s295_s20, 4  ;;  %s297_s23 = smov 4   ;;  %s29_s21 = int_to_ptr.vmem [resolvable:$true] %s28_s21 }
   0x7   :  { %34 = dma.hbm_to_vmem [thread:$0]  %s27_s19, 1024, %s29_s21, [#allocation6], %s296_s22, %s296_s22, %s297_s23  }
   0x8   :  { %288 = dma.done.wait [#allocation3], 64  }
   0x9   :  { %289 = vsyncadd [#allocation3], 4294967232 }
   0xa   :  { %290 = dma.done.wait [#allocation6], 1024  }
   0xb   :  { %291 = vsyncadd [#allocation6], 4294966272  ;;  %v205_v0 = vld [vmem:[#allocation5 + $0x38] sm:$0xff]  ;;  %v204_v1 = vld [vmem:[#allocation5 + $0x30] sm:$0xff]  ;;  %s298_s24 = smov [#allocation7]  }
   0xc   :  { %114 = vmatpush.bf16.msra.mxu0 %v205_v0  ;;  %v203_v2 = vld [vmem:[#allocation5 + $0x28] sm:$0xff]  ;;  %v202_v3 = vld [vmem:[#allocation5 + $0x20] sm:$0xff]  ;;  %v201_v4 = vld [vmem:[#allocation5 + $0x18] sm:$0xff]  ;;  %s152_s25 = sshll.u32 %s298_s24, 4  ;;  %s153_s25 = int_to_ptr.vmem [resolvable:$true] %s152_s25 }
   0xd   :  { %v200_v5 = vld [vmem:[#allocation5 + $0x10] sm:$0xff]  ;;  %v199_v6 = vld [vmem:[#allocation5 + $0x8] sm:$0xff]  ;;  %v198_v7 = vld [vmem:[#allocation5] sm:$0xff] }
   0xe   :  { %v45_v8 = vld [vmem:[#allocation2] sm:$0xf] }
   0xf   :  { %v211_v9 = vld [vmem:[%s333_s2] ss:$0 sm:$0xff]  ;;  %s154_s2 = sshll.u32 %s334_s3, 4  ;;  %s155_s2 = int_to_ptr.hbm [resolvable:$true] %s154_s2 }
  0x10   :  { %115 = vmatpush.bf16.msra.mxu0 %v204_v1 }
  0x14   :  { %116 = vmatpush.bf16.msra.mxu0 %v203_v2 }
  0x18   :  { %117 = vmatpush.bf16.msra.mxu0 %v202_v3 }
  0x1c   :  { %118 = vmatpush.bf16.msra.mxu0 %v201_v4 }
  0x20   :  { %119 = vmatpush.bf16.msra.mxu0 %v200_v5 }
  0x24   :  { %120 = vmatpush.bf16.msra.mxu0 %v199_v6 }
  0x28   :  { %121 = vmatpush.bf16.msra.mxu0 %v198_v7 }
  0x2b   :  { %122 = vmatmul.bf16.vlgmr.msra.gmra.mxu0 %v45_v8 }
  0xa8   :  { %v123_v10 = vpop.f32.mrf.mxu0 }
  0xa9   :  { %v124_v11 = vadd.f32 %v211_v9, %v123_v10 }
  0xab   :  { %v197_v12 = vmul.f32 -1.442695, %v124_v11 }
  0xad   :  { %212 = vpow2.f32 %v197_v12 }
  0xb0   :  { %v125_v13 = vpop.f32.mrf.mxu0 }
  0xb3   :  { %v213_v14 = vpop.eup %212 }
  0xb4   :  { %v130_v15 = vadd.f32 1.0, %v213_v14 }
  0xb6   :  { %214 = vrcp.f32 %v130_v15  ;;  %v142_v19 = vand.u32 2147483648, %v130_v15  ;;  %v140_v21 = vand.u32 2147483647, %v130_v15  ;;  %vm136_vm1 = vweird.f32 %v130_v15 }
  0xb8   :  { %v143_v23 = vor.u32 1.1754944e-38, %v142_v19  ;;  %vm141_vm3 = vcmp.eq.f32.partialorder %v140_v21, 8.507059e+37 }
  0xbc   :  { %v215_v16 = vpop.eup %214 }
  0xbd   :  { %v132_v17 = vmul.f32 %v215_v16, %v130_v15  ;;  %vm137_vm0 = vweird.f32 %v215_v16 }
  0xbe   :  { %vm138_vm2 = vmor %vm136_vm1, %vm137_vm0 }
  0xbf   :  { %v133_v18 = vsub.f32 1.0, %v132_v17 }
  0xc1   :  { %v134_v20 = vmul.f32 %v215_v16, %v133_v18 }
  0xc3   :  { %v135_v22 = vadd.f32 %v215_v16, %v134_v20 }
  0xc5   :  { %v139_v24 = vsel %vm138_vm2, %v215_v16, %v135_v22 }
  0xc6   :  { %v144_v25 = vsel %vm141_vm3, %v143_v23, %v139_v24 }
  0xc7   :  { %146 = vst [vmem:[#allocation7] sm:$0xff] %v144_v25 }
  0xc8   :  { %157 = dma.vmem_to_hbm [thread:$0]  %s153_s25, 128, %s155_s2, [#allocation4]  }
  0xc9   :  { %292 = dma.done.wait [#allocation4], 128  }
  0xca   :  { %293 = vsyncadd [#allocation4], 4294967168 }
  0xcb   :  { %162 = vsyncpa [#allocation3], 1 }
  0xcc   :  { %163 = vsyncpa [#allocation6], 1 }
  0xcd   :  { %164 = vsyncpa [#allocation4], 1 }

</bundles_post_ra>
